<compile_context>
chip_gen: v7x
topology: tpu7x:2x2x1
jax: 0.10.0
libtpu: 0.0.40
codegen_flags: <defaults>
</compile_context>

<pallas_src>
import functools

import jax
import jax.numpy as jnp
from jax.experimental import pallas as pl
from jax.experimental.pallas import tpu as pltpu


def ffnn_kernel(ids_ref, v_hbm, w_ref, b_ref, out_ref, buf_ref, sem, acc_ref,
                *, seq_len, chunk):
    # ids_ref : (padded_seq,) int32 token ids in SMEM (scalar prefetch)
    # v_hbm   : (VOCAB, EMB) f32 embedding table, raw HBM ref (manual DMA gather)
    # w_ref   : (NUM_CLASSES, EMB) f32 linear weight (torch layout), resident in VMEM
    # b_ref   : (NUM_CLASSES, 1) f32 bias, resident in VMEM
    # out_ref : (NUM_CLASSES, 1) f32 log-probabilities
    # buf_ref : (CHUNK, EMB) f32 VMEM gather buffer
    # sem     : (CHUNK,) DMA semaphores, one per in-flight row copy
    # acc_ref : (1, EMB) f32 VMEM accumulator for the bag-of-words sum
    t = pl.program_id(0)

    @pl.when(t == 0)
    def _():
        acc_ref[...] = jnp.zeros_like(acc_ref)

    base = t * chunk

    # Gather this chunk's embedding rows: issue all row DMAs first so they
    # overlap in the DMA engine, then wait on them.
    copies = []
    for j in range(chunk):
        tok = ids_ref[base + j]
        cp = pltpu.make_async_copy(
            v_hbm.at[pl.ds(tok, 1)],      # (1, EMB) row in HBM
            buf_ref.at[pl.ds(j, 1)],      # (1, EMB) slot in VMEM
            sem.at[j],
        )
        cp.start()
        copies.append(cp)
    for cp in copies:
        cp.wait()

    # Mask out padded tokens (sequence padded up to a multiple of CHUNK) and
    # reduce over the chunk: torch.sum(self.V(X), dim=0), chunk by chunk.
    valid = jnp.minimum(chunk, seq_len - base)
    row_idx = jax.lax.broadcasted_iota(jnp.int32, buf_ref.shape, 0)
    rows = jnp.where(row_idx < valid, buf_ref[...], 0.0)
    acc_ref[...] += jnp.sum(rows, axis=0, keepdims=True)          # (1, EMB)

    @pl.when(t == pl.num_programs(0) - 1)
    def _():
        h = jnp.maximum(acc_ref[...], 0.0)                         # (1, EMB)  ReLU
        # Tiny linear on the VPU: broadcast (1,EMB) against (NC,EMB), lane-reduce.
        prod = h * w_ref[...]                                      # (NC, EMB)
        logits = jnp.sum(prod, axis=-1, keepdims=True) + b_ref[...]  # (NC, 1)
        # LogSoftmax over the class axis (torch dim=0 of the 1-D output)
        m = jnp.max(logits, axis=0, keepdims=True)
        z = logits - m
        lse = jnp.log(jnp.sum(jnp.exp(z), axis=0, keepdims=True))
        out_ref[...] = z - lse


def ffnn_forward(x_idx, V, W, b, *, chunk=8):
    """x_idx: (seq,) int; V: (VOCAB, EMB); W: (NUM_CLASSES, EMB) torch layout; b: (NUM_CLASSES,)."""
    seq = int(x_idx.shape[0])
    vocab, emb = V.shape
    num_classes = W.shape[0]

    chunk = max(1, min(chunk, seq))
    num_chunks = pl.cdiv(seq, chunk)
    padded = num_chunks * chunk

    # Pad ids with 0 (a valid row); padded rows are masked out of the sum in-kernel.
    ids = jnp.zeros((padded,), jnp.int32).at[:seq].set(x_idx.astype(jnp.int32))
    Vf = V.astype(jnp.float32)
    Wf = W.astype(jnp.float32)
    b2 = b.astype(jnp.float32).reshape(num_classes, 1)

    kernel = functools.partial(ffnn_kernel, seq_len=seq, chunk=chunk)

    out = pl.pallas_call(
        kernel,
        out_shape=jax.ShapeDtypeStruct((num_classes, 1), jnp.float32),
        grid_spec=pltpu.PrefetchScalarGridSpec(
            num_scalar_prefetch=1,          # token ids land in SMEM
            grid=(num_chunks,),             # one grid step per chunk of tokens
            in_specs=[
                # Embedding table stays in HBM; rows are DMA-gathered manually.
                pl.BlockSpec(memory_space=pl.ANY),
                # Small weights: constant index_map -> fetched once, stay resident.
                pl.BlockSpec((num_classes, emb), lambda t, ids: (0, 0)),
                pl.BlockSpec((num_classes, 1), lambda t, ids: (0, 0)),
            ],
            out_specs=pl.BlockSpec((num_classes, 1), lambda t, ids: (0, 0)),
            scratch_shapes=[
                pltpu.VMEM((chunk, emb), jnp.float32),   # gathered rows
                pltpu.SemaphoreType.DMA((chunk,)),       # one sem per row DMA
                pltpu.VMEM((1, emb), jnp.float32),       # bag-of-words accumulator
            ],
        ),
        compiler_params=pltpu.CompilerParams(
            dimension_semantics=("arbitrary",)),         # seq axis is a reduction
    )(ids, Vf, Wf, b2)
    return out[:, 0]  # (NUM_CLASSES,)


def xavier_uniform(key, shape, fan_in, fan_out):
    bound = (6.0 / (fan_in + fan_out)) ** 0.5
    return jax.random.uniform(key, shape, jnp.float32, -bound, bound)


if __name__ == "__main__":
    VOCAB_SIZE, DIM_EMB, NUM_CLASSES, SEQ = 32, 10, 2, 8

    key = jax.random.PRNGKey(0)
    k_v, k_w, k_b, k_x = jax.random.split(key, 4)

    # Deterministic parameter init (matches the __init__ shapes / xavier_uniform)
    V = xavier_uniform(k_v, (VOCAB_SIZE, DIM_EMB), VOCAB_SIZE, DIM_EMB)
    W = xavier_uniform(k_w, (NUM_CLASSES, DIM_EMB), DIM_EMB, NUM_CLASSES)  # torch layout
    b_bound = 1.0 / (DIM_EMB ** 0.5)
    b = jax.random.uniform(k_b, (NUM_CLASSES,), jnp.float32, -b_bound, b_bound)

    # Example input: a sequence of token indices (must be in [0, VOCAB_SIZE))
    X = jax.random.randint(k_x, (SEQ,), 0, VOCAB_SIZE, dtype=jnp.int32)

    out = ffnn_forward(X, V, W, b)
    out = jax.block_until_ready(out)

    # Pure-JAX reference check
    ref_v = jnp.sum(V[X], axis=0)
    ref_h = jnp.maximum(ref_v, 0.0)
    ref_logits = ref_h @ W.T + b
    ref = jax.nn.log_softmax(ref_logits, axis=0)
    assert jnp.allclose(out, ref, atol=1e-5), (out, ref)

    print("KERNEL_OK")
</pallas_src>

<mosaic_0001>
module attributes {stable_mosaic.version = 11 : i64} {
  func.func @ffnn_kernel(%arg0: i32, %arg1: memref<8xi32, #tpu.memory_space<smem>>, %arg2: memref<32x10xf32, #tpu.memory_space<any>>, %arg3: memref<2x10xf32, #tpu.memory_space<vmem>>, %arg4: memref<2x1xf32, #tpu.memory_space<vmem>>, %arg5: memref<2x1xf32, #tpu.memory_space<vmem>>, %arg6: memref<8x10xf32, #tpu.memory_space<vmem>>, %arg7: memref<8x!tpu.dma_semaphore, #tpu.memory_space<semaphore_mem>>, %arg8: memref<1x10xf32, #tpu.memory_space<vmem>>) attributes {dimension_semantics = [#tpu.dimension_semantics<arbitrary>], iteration_bounds = array<i64: 1>, scalar_prefetch = 1 : i64, scratch_operands = 3 : i64, tpu.core_type = #tpu.core_type<tc>, window_params = [{}, {pipeline_mode = #tpu.pipeline_mode<synchronous>, transform_indices = @transform_1, window_bounds = array<i64: 2, 10>}, {pipeline_mode = #tpu.pipeline_mode<synchronous>, transform_indices = @transform_2, window_bounds = array<i64: 2, 1>}, {pipeline_mode = #tpu.pipeline_mode<synchronous>, transform_indices = @transform_3, window_bounds = array<i64: 2, 1>}]} {
    %c0_i32 = arith.constant 0 : i32
    %0 = arith.cmpi eq, %arg0, %c0_i32 : i32
    %1 = arith.extui %0 : i1 to i32
    %c0_i32_0 = arith.constant 0 : i32
    %2 = arith.cmpi ne, %1, %c0_i32_0 : i32
    scf.if %2 {
      %cst_76 = arith.constant 0.000000e+00 : f32
      %108 = vector.broadcast %cst_76 : f32 to vector<1x10xf32>
      %c0_77 = arith.constant 0 : index
      %c0_78 = arith.constant 0 : index
      %109 = vector.load %arg8[%c0_77, %c0_78] : memref<1x10xf32, #tpu.memory_space<vmem>>, vector<1x10xf32>
      tpu.vector_store %arg8[%c0_77, %c0_78], %108 {strides = array<i32>} : memref<1x10xf32, #tpu.memory_space<vmem>>, vector<1x10xf32>,
    } else {
    }
    %c8_i32 = arith.constant 8 : i32
    %3 = arith.muli %arg0, %c8_i32 : i32
    %c0_i32_1 = arith.constant 0 : i32
    %4 = arith.addi %3, %c0_i32_1 : i32
    %5 = arith.index_cast %4 : i32 to index
    %6 = memref.load %arg1[%5] : memref<8xi32, #tpu.memory_space<smem>>
    %c0_i32_2 = arith.constant 0 : i32
    %c0_i32_3 = arith.constant 0 : i32
    %7 = tpu.memref_slice %arg2[%6, %c0_i32_3] : memref<32x10xf32, #tpu.memory_space<any>> -> memref<1x10xf32, #tpu.memory_space<any>>
    %c0_i32_4 = arith.constant 0 : i32
    %c0_i32_5 = arith.constant 0 : i32
    %8 = tpu.memref_slice %arg6[%c0_i32_4, %c0_i32_5] : memref<8x10xf32, #tpu.memory_space<vmem>> -> memref<1x10xf32, #tpu.memory_space<vmem>>
    %9 = tpu.memref_slice %arg7[%c0_i32_2] : memref<8x!tpu.dma_semaphore, #tpu.memory_space<semaphore_mem>> -> memref<1x!tpu.dma_semaphore, #tpu.memory_space<semaphore_mem>>
    %10 = tpu.memref_squeeze %9 : memref<1x!tpu.dma_semaphore, #tpu.memory_space<semaphore_mem>> -> memref<!tpu.dma_semaphore, #tpu.memory_space<semaphore_mem>>
    tpu.enqueue_dma source(%7 : memref<1x10xf32, #tpu.memory_space<any>>) target(%8 : memref<1x10xf32, #tpu.memory_space<vmem>>) target_semaphore(%10 : memref<!tpu.dma_semaphore, #tpu.memory_space<semaphore_mem>>)
    %c1_i32 = arith.constant 1 : i32
    %11 = arith.addi %3, %c1_i32 : i32
    %12 = arith.index_cast %11 : i32 to index
    %13 = memref.load %arg1[%12] : memref<8xi32, #tpu.memory_space<smem>>
    %c1_i32_6 = arith.constant 1 : i32
    %c0_i32_7 = arith.constant 0 : i32
    %14 = tpu.memref_slice %arg2[%13, %c0_i32_7] : memref<32x10xf32, #tpu.memory_space<any>> -> memref<1x10xf32, #tpu.memory_space<any>>
    %c1_i32_8 = arith.constant 1 : i32
    %c0_i32_9 = arith.constant 0 : i32
    %15 = tpu.memref_slice %arg6[%c1_i32_8, %c0_i32_9] : memref<8x10xf32, #tpu.memory_space<vmem>> -> memref<1x10xf32, #tpu.memory_space<vmem>>
    %16 = tpu.memref_slice %arg7[%c1_i32_6] : memref<8x!tpu.dma_semaphore, #tpu.memory_space<semaphore_mem>> -> memref<1x!tpu.dma_semaphore, #tpu.memory_space<semaphore_mem>>
    %17 = tpu.memref_squeeze %16 : memref<1x!tpu.dma_semaphore, #tpu.memory_space<semaphore_mem>> -> memref<!tpu.dma_semaphore, #tpu.memory_space<semaphore_mem>>
    tpu.enqueue_dma source(%14 : memref<1x10xf32, #tpu.memory_space<any>>) target(%15 : memref<1x10xf32, #tpu.memory_space<vmem>>) target_semaphore(%17 : memref<!tpu.dma_semaphore, #tpu.memory_space<semaphore_mem>>)
    %c2_i32 = arith.constant 2 : i32
    %18 = arith.addi %3, %c2_i32 : i32
    %19 = arith.index_cast %18 : i32 to index
    %20 = memref.load %arg1[%19] : memref<8xi32, #tpu.memory_space<smem>>
    %c2_i32_10 = arith.constant 2 : i32
    %c0_i32_11 = arith.constant 0 : i32
    %21 = tpu.memref_slice %arg2[%20, %c0_i32_11] : memref<32x10xf32, #tpu.memory_space<any>> -> memref<1x10xf32, #tpu.memory_space<any>>
    %c2_i32_12 = arith.constant 2 : i32
    %c0_i32_13 = arith.constant 0 : i32
    %22 = tpu.memref_slice %arg6[%c2_i32_12, %c0_i32_13] : memref<8x10xf32, #tpu.memory_space<vmem>> -> memref<1x10xf32, #tpu.memory_space<vmem>>
    %23 = tpu.memref_slice %arg7[%c2_i32_10] : memref<8x!tpu.dma_semaphore, #tpu.memory_space<semaphore_mem>> -> memref<1x!tpu.dma_semaphore, #tpu.memory_space<semaphore_mem>>
    %24 = tpu.memref_squeeze %23 : memref<1x!tpu.dma_semaphore, #tpu.memory_space<semaphore_mem>> -> memref<!tpu.dma_semaphore, #tpu.memory_space<semaphore_mem>>
    tpu.enqueue_dma source(%21 : memref<1x10xf32, #tpu.memory_space<any>>) target(%22 : memref<1x10xf32, #tpu.memory_space<vmem>>) target_semaphore(%24 : memref<!tpu.dma_semaphore, #tpu.memory_space<semaphore_mem>>)
    %c3_i32 = arith.constant 3 : i32
    %25 = arith.addi %3, %c3_i32 : i32
    %26 = arith.index_cast %25 : i32 to index
    %27 = memref.load %arg1[%26] : memref<8xi32, #tpu.memory_space<smem>>
    %c3_i32_14 = arith.constant 3 : i32
    %c0_i32_15 = arith.constant 0 : i32
    %28 = tpu.memref_slice %arg2[%27, %c0_i32_15] : memref<32x10xf32, #tpu.memory_space<any>> -> memref<1x10xf32, #tpu.memory_space<any>>
    %c3_i32_16 = arith.constant 3 : i32
    %c0_i32_17 = arith.constant 0 : i32
    %29 = tpu.memref_slice %arg6[%c3_i32_16, %c0_i32_17] : memref<8x10xf32, #tpu.memory_space<vmem>> -> memref<1x10xf32, #tpu.memory_space<vmem>>
    %30 = tpu.memref_slice %arg7[%c3_i32_14] : memref<8x!tpu.dma_semaphore, #tpu.memory_space<semaphore_mem>> -> memref<1x!tpu.dma_semaphore, #tpu.memory_space<semaphore_mem>>
    %31 = tpu.memref_squeeze %30 : memref<1x!tpu.dma_semaphore, #tpu.memory_space<semaphore_mem>> -> memref<!tpu.dma_semaphore, #tpu.memory_space<semaphore_mem>>
    tpu.enqueue_dma source(%28 : memref<1x10xf32, #tpu.memory_space<any>>) target(%29 : memref<1x10xf32, #tpu.memory_space<vmem>>) target_semaphore(%31 : memref<!tpu.dma_semaphore, #tpu.memory_space<semaphore_mem>>)
    %c4_i32 = arith.constant 4 : i32
    %32 = arith.addi %3, %c4_i32 : i32
    %33 = arith.index_cast %32 : i32 to index
    %34 = memref.load %arg1[%33] : memref<8xi32, #tpu.memory_space<smem>>
    %c4_i32_18 = arith.constant 4 : i32
    %c0_i32_19 = arith.constant 0 : i32
    %35 = tpu.memref_slice %arg2[%34, %c0_i32_19] : memref<32x10xf32, #tpu.memory_space<any>> -> memref<1x10xf32, #tpu.memory_space<any>>
    %c4_i32_20 = arith.constant 4 : i32
    %c0_i32_21 = arith.constant 0 : i32
    %36 = tpu.memref_slice %arg6[%c4_i32_20, %c0_i32_21] : memref<8x10xf32, #tpu.memory_space<vmem>> -> memref<1x10xf32, #tpu.memory_space<vmem>>
    %37 = tpu.memref_slice %arg7[%c4_i32_18] : memref<8x!tpu.dma_semaphore, #tpu.memory_space<semaphore_mem>> -> memref<1x!tpu.dma_semaphore, #tpu.memory_space<semaphore_mem>>
    %38 = tpu.memref_squeeze %37 : memref<1x!tpu.dma_semaphore, #tpu.memory_space<semaphore_mem>> -> memref<!tpu.dma_semaphore, #tpu.memory_space<semaphore_mem>>
    tpu.enqueue_dma source(%35 : memref<1x10xf32, #tpu.memory_space<any>>) target(%36 : memref<1x10xf32, #tpu.memory_space<vmem>>) target_semaphore(%38 : memref<!tpu.dma_semaphore, #tpu.memory_space<semaphore_mem>>)
    %c5_i32 = arith.constant 5 : i32
    %39 = arith.addi %3, %c5_i32 : i32
    %40 = arith.index_cast %39 : i32 to index
    %41 = memref.load %arg1[%40] : memref<8xi32, #tpu.memory_space<smem>>
    %c5_i32_22 = arith.constant 5 : i32
    %c0_i32_23 = arith.constant 0 : i32
    %42 = tpu.memref_slice %arg2[%41, %c0_i32_23] : memref<32x10xf32, #tpu.memory_space<any>> -> memref<1x10xf32, #tpu.memory_space<any>>
    %c5_i32_24 = arith.constant 5 : i32
    %c0_i32_25 = arith.constant 0 : i32
    %43 = tpu.memref_slice %arg6[%c5_i32_24, %c0_i32_25] : memref<8x10xf32, #tpu.memory_space<vmem>> -> memref<1x10xf32, #tpu.memory_space<vmem>>
    %44 = tpu.memref_slice %arg7[%c5_i32_22] : memref<8x!tpu.dma_semaphore, #tpu.memory_space<semaphore_mem>> -> memref<1x!tpu.dma_semaphore, #tpu.memory_space<semaphore_mem>>
    %45 = tpu.memref_squeeze %44 : memref<1x!tpu.dma_semaphore, #tpu.memory_space<semaphore_mem>> -> memref<!tpu.dma_semaphore, #tpu.memory_space<semaphore_mem>>
    tpu.enqueue_dma source(%42 : memref<1x10xf32, #tpu.memory_space<any>>) target(%43 : memref<1x10xf32, #tpu.memory_space<vmem>>) target_semaphore(%45 : memref<!tpu.dma_semaphore, #tpu.memory_space<semaphore_mem>>)
    %c6_i32 = arith.constant 6 : i32
    %46 = arith.addi %3, %c6_i32 : i32
    %47 = arith.index_cast %46 : i32 to index
    %48 = memref.load %arg1[%47] : memref<8xi32, #tpu.memory_space<smem>>
    %c6_i32_26 = arith.constant 6 : i32
    %c0_i32_27 = arith.constant 0 : i32
    %49 = tpu.memref_slice %arg2[%48, %c0_i32_27] : memref<32x10xf32, #tpu.memory_space<any>> -> memref<1x10xf32, #tpu.memory_space<any>>
    %c6_i32_28 = arith.constant 6 : i32
    %c0_i32_29 = arith.constant 0 : i32
    %50 = tpu.memref_slice %arg6[%c6_i32_28, %c0_i32_29] : memref<8x10xf32, #tpu.memory_space<vmem>> -> memref<1x10xf32, #tpu.memory_space<vmem>>
    %51 = tpu.memref_slice %arg7[%c6_i32_26] : memref<8x!tpu.dma_semaphore, #tpu.memory_space<semaphore_mem>> -> memref<1x!tpu.dma_semaphore, #tpu.memory_space<semaphore_mem>>
    %52 = tpu.memref_squeeze %51 : memref<1x!tpu.dma_semaphore, #tpu.memory_space<semaphore_mem>> -> memref<!tpu.dma_semaphore, #tpu.memory_space<semaphore_mem>>
    tpu.enqueue_dma source(%49 : memref<1x10xf32, #tpu.memory_space<any>>) target(%50 : memref<1x10xf32, #tpu.memory_space<vmem>>) target_semaphore(%52 : memref<!tpu.dma_semaphore, #tpu.memory_space<semaphore_mem>>)
    %c7_i32 = arith.constant 7 : i32
    %53 = arith.addi %3, %c7_i32 : i32
    %54 = arith.index_cast %53 : i32 to index
    %55 = memref.load %arg1[%54] : memref<8xi32, #tpu.memory_space<smem>>
    %c7_i32_30 = arith.constant 7 : i32
    %c0_i32_31 = arith.constant 0 : i32
    %56 = tpu.memref_slice %arg2[%55, %c0_i32_31] : memref<32x10xf32, #tpu.memory_space<any>> -> memref<1x10xf32, #tpu.memory_space<any>>
    %c7_i32_32 = arith.constant 7 : i32
    %c0_i32_33 = arith.constant 0 : i32
    %57 = tpu.memref_slice %arg6[%c7_i32_32, %c0_i32_33] : memref<8x10xf32, #tpu.memory_space<vmem>> -> memref<1x10xf32, #tpu.memory_space<vmem>>
    %58 = tpu.memref_slice %arg7[%c7_i32_30] : memref<8x!tpu.dma_semaphore, #tpu.memory_space<semaphore_mem>> -> memref<1x!tpu.dma_semaphore, #tpu.memory_space<semaphore_mem>>
    %59 = tpu.memref_squeeze %58 : memref<1x!tpu.dma_semaphore, #tpu.memory_space<semaphore_mem>> -> memref<!tpu.dma_semaphore, #tpu.memory_space<semaphore_mem>>
    tpu.enqueue_dma source(%56 : memref<1x10xf32, #tpu.memory_space<any>>) target(%57 : memref<1x10xf32, #tpu.memory_space<vmem>>) target_semaphore(%59 : memref<!tpu.dma_semaphore, #tpu.memory_space<semaphore_mem>>)
    %c0_i32_34 = arith.constant 0 : i32
    %c0_i32_35 = arith.constant 0 : i32
    %60 = tpu.memref_slice %arg2[%6, %c0_i32_35] : memref<32x10xf32, #tpu.memory_space<any>> -> memref<1x10xf32, #tpu.memory_space<any>>
    %c0_i32_36 = arith.constant 0 : i32
    %c0_i32_37 = arith.constant 0 : i32
    %61 = tpu.memref_slice %arg6[%c0_i32_36, %c0_i32_37] : memref<8x10xf32, #tpu.memory_space<vmem>> -> memref<1x10xf32, #tpu.memory_space<vmem>>
    %62 = tpu.memref_slice %arg7[%c0_i32_34] : memref<8x!tpu.dma_semaphore, #tpu.memory_space<semaphore_mem>> -> memref<1x!tpu.dma_semaphore, #tpu.memory_space<semaphore_mem>>
    %63 = tpu.memref_squeeze %62 : memref<1x!tpu.dma_semaphore, #tpu.memory_space<semaphore_mem>> -> memref<!tpu.dma_semaphore, #tpu.memory_space<semaphore_mem>>
    tpu.wait_dma2 semaphore(%63 : memref<!tpu.dma_semaphore, #tpu.memory_space<semaphore_mem>>) src(%60 : memref<1x10xf32, #tpu.memory_space<any>>) dst(%61 : memref<1x10xf32, #tpu.memory_space<vmem>>)
    %c1_i32_38 = arith.constant 1 : i32
    %c0_i32_39 = arith.constant 0 : i32
    %64 = tpu.memref_slice %arg2[%13, %c0_i32_39] : memref<32x10xf32, #tpu.memory_space<any>> -> memref<1x10xf32, #tpu.memory_space<any>>
    %c1_i32_40 = arith.constant 1 : i32
    %c0_i32_41 = arith.constant 0 : i32
    %65 = tpu.memref_slice %arg6[%c1_i32_40, %c0_i32_41] : memref<8x10xf32, #tpu.memory_space<vmem>> -> memref<1x10xf32, #tpu.memory_space<vmem>>
    %66 = tpu.memref_slice %arg7[%c1_i32_38] : memref<8x!tpu.dma_semaphore, #tpu.memory_space<semaphore_mem>> -> memref<1x!tpu.dma_semaphore, #tpu.memory_space<semaphore_mem>>
    %67 = tpu.memref_squeeze %66 : memref<1x!tpu.dma_semaphore, #tpu.memory_space<semaphore_mem>> -> memref<!tpu.dma_semaphore, #tpu.memory_space<semaphore_mem>>
    tpu.wait_dma2 semaphore(%67 : memref<!tpu.dma_semaphore, #tpu.memory_space<semaphore_mem>>) src(%64 : memref<1x10xf32, #tpu.memory_space<any>>) dst(%65 : memref<1x10xf32, #tpu.memory_space<vmem>>)
    %c2_i32_42 = arith.constant 2 : i32
    %c0_i32_43 = arith.constant 0 : i32
    %68 = tpu.memref_slice %arg2[%20, %c0_i32_43] : memref<32x10xf32, #tpu.memory_space<any>> -> memref<1x10xf32, #tpu.memory_space<any>>
    %c2_i32_44 = arith.constant 2 : i32
    %c0_i32_45 = arith.constant 0 : i32
    %69 = tpu.memref_slice %arg6[%c2_i32_44, %c0_i32_45] : memref<8x10xf32, #tpu.memory_space<vmem>> -> memref<1x10xf32, #tpu.memory_space<vmem>>
    %70 = tpu.memref_slice %arg7[%c2_i32_42] : memref<8x!tpu.dma_semaphore, #tpu.memory_space<semaphore_mem>> -> memref<1x!tpu.dma_semaphore, #tpu.memory_space<semaphore_mem>>
    %71 = tpu.memref_squeeze %70 : memref<1x!tpu.dma_semaphore, #tpu.memory_space<semaphore_mem>> -> memref<!tpu.dma_semaphore, #tpu.memory_space<semaphore_mem>>
    tpu.wait_dma2 semaphore(%71 : memref<!tpu.dma_semaphore, #tpu.memory_space<semaphore_mem>>) src(%68 : memref<1x10xf32, #tpu.memory_space<any>>) dst(%69 : memref<1x10xf32, #tpu.memory_space<vmem>>)
    %c3_i32_46 = arith.constant 3 : i32
    %c0_i32_47 = arith.constant 0 : i32
    %72 = tpu.memref_slice %arg2[%27, %c0_i32_47] : memref<32x10xf32, #tpu.memory_space<any>> -> memref<1x10xf32, #tpu.memory_space<any>>
    %c3_i32_48 = arith.constant 3 : i32
    %c0_i32_49 = arith.constant 0 : i32
    %73 = tpu.memref_slice %arg6[%c3_i32_48, %c0_i32_49] : memref<8x10xf32, #tpu.memory_space<vmem>> -> memref<1x10xf32, #tpu.memory_space<vmem>>
    %74 = tpu.memref_slice %arg7[%c3_i32_46] : memref<8x!tpu.dma_semaphore, #tpu.memory_space<semaphore_mem>> -> memref<1x!tpu.dma_semaphore, #tpu.memory_space<semaphore_mem>>
    %75 = tpu.memref_squeeze %74 : memref<1x!tpu.dma_semaphore, #tpu.memory_space<semaphore_mem>> -> memref<!tpu.dma_semaphore, #tpu.memory_space<semaphore_mem>>
    tpu.wait_dma2 semaphore(%75 : memref<!tpu.dma_semaphore, #tpu.memory_space<semaphore_mem>>) src(%72 : memref<1x10xf32, #tpu.memory_space<any>>) dst(%73 : memref<1x10xf32, #tpu.memory_space<vmem>>)
    %c4_i32_50 = arith.constant 4 : i32
    %c0_i32_51 = arith.constant 0 : i32
    %76 = tpu.memref_slice %arg2[%34, %c0_i32_51] : memref<32x10xf32, #tpu.memory_space<any>> -> memref<1x10xf32, #tpu.memory_space<any>>
    %c4_i32_52 = arith.constant 4 : i32
    %c0_i32_53 = arith.constant 0 : i32
    %77 = tpu.memref_slice %arg6[%c4_i32_52, %c0_i32_53] : memref<8x10xf32, #tpu.memory_space<vmem>> -> memref<1x10xf32, #tpu.memory_space<vmem>>
    %78 = tpu.memref_slice %arg7[%c4_i32_50] : memref<8x!tpu.dma_semaphore, #tpu.memory_space<semaphore_mem>> -> memref<1x!tpu.dma_semaphore, #tpu.memory_space<semaphore_mem>>
    %79 = tpu.memref_squeeze %78 : memref<1x!tpu.dma_semaphore, #tpu.memory_space<semaphore_mem>> -> memref<!tpu.dma_semaphore, #tpu.memory_space<semaphore_mem>>
    tpu.wait_dma2 semaphore(%79 : memref<!tpu.dma_semaphore, #tpu.memory_space<semaphore_mem>>) src(%76 : memref<1x10xf32, #tpu.memory_space<any>>) dst(%77 : memref<1x10xf32, #tpu.memory_space<vmem>>)
    %c5_i32_54 = arith.constant 5 : i32
    %c0_i32_55 = arith.constant 0 : i32
    %80 = tpu.memref_slice %arg2[%41, %c0_i32_55] : memref<32x10xf32, #tpu.memory_space<any>> -> memref<1x10xf32, #tpu.memory_space<any>>
    %c5_i32_56 = arith.constant 5 : i32
    %c0_i32_57 = arith.constant 0 : i32
    %81 = tpu.memref_slice %arg6[%c5_i32_56, %c0_i32_57] : memref<8x10xf32, #tpu.memory_space<vmem>> -> memref<1x10xf32, #tpu.memory_space<vmem>>
    %82 = tpu.memref_slice %arg7[%c5_i32_54] : memref<8x!tpu.dma_semaphore, #tpu.memory_space<semaphore_mem>> -> memref<1x!tpu.dma_semaphore, #tpu.memory_space<semaphore_mem>>
    %83 = tpu.memref_squeeze %82 : memref<1x!tpu.dma_semaphore, #tpu.memory_space<semaphore_mem>> -> memref<!tpu.dma_semaphore, #tpu.memory_space<semaphore_mem>>
    tpu.wait_dma2 semaphore(%83 : memref<!tpu.dma_semaphore, #tpu.memory_space<semaphore_mem>>) src(%80 : memref<1x10xf32, #tpu.memory_space<any>>) dst(%81 : memref<1x10xf32, #tpu.memory_space<vmem>>)
    %c6_i32_58 = arith.constant 6 : i32
    %c0_i32_59 = arith.constant 0 : i32
    %84 = tpu.memref_slice %arg2[%48, %c0_i32_59] : memref<32x10xf32, #tpu.memory_space<any>> -> memref<1x10xf32, #tpu.memory_space<any>>
    %c6_i32_60 = arith.constant 6 : i32
    %c0_i32_61 = arith.constant 0 : i32
    %85 = tpu.memref_slice %arg6[%c6_i32_60, %c0_i32_61] : memref<8x10xf32, #tpu.memory_space<vmem>> -> memref<1x10xf32, #tpu.memory_space<vmem>>
    %86 = tpu.memref_slice %arg7[%c6_i32_58] : memref<8x!tpu.dma_semaphore, #tpu.memory_space<semaphore_mem>> -> memref<1x!tpu.dma_semaphore, #tpu.memory_space<semaphore_mem>>
    %87 = tpu.memref_squeeze %86 : memref<1x!tpu.dma_semaphore, #tpu.memory_space<semaphore_mem>> -> memref<!tpu.dma_semaphore, #tpu.memory_space<semaphore_mem>>
    tpu.wait_dma2 semaphore(%87 : memref<!tpu.dma_semaphore, #tpu.memory_space<semaphore_mem>>) src(%84 : memref<1x10xf32, #tpu.memory_space<any>>) dst(%85 : memref<1x10xf32, #tpu.memory_space<vmem>>)
    %c7_i32_62 = arith.constant 7 : i32
    %c0_i32_63 = arith.constant 0 : i32
    %88 = tpu.memref_slice %arg2[%55, %c0_i32_63] : memref<32x10xf32, #tpu.memory_space<any>> -> memref<1x10xf32, #tpu.memory_space<any>>
    %c7_i32_64 = arith.constant 7 : i32
    %c0_i32_65 = arith.constant 0 : i32
    %89 = tpu.memref_slice %arg6[%c7_i32_64, %c0_i32_65] : memref<8x10xf32, #tpu.memory_space<vmem>> -> memref<1x10xf32, #tpu.memory_space<vmem>>
    %90 = tpu.memref_slice %arg7[%c7_i32_62] : memref<8x!tpu.dma_semaphore, #tpu.memory_space<semaphore_mem>> -> memref<1x!tpu.dma_semaphore, #tpu.memory_space<semaphore_mem>>
    %91 = tpu.memref_squeeze %90 : memref<1x!tpu.dma_semaphore, #tpu.memory_space<semaphore_mem>> -> memref<!tpu.dma_semaphore, #tpu.memory_space<semaphore_mem>>
    tpu.wait_dma2 semaphore(%91 : memref<!tpu.dma_semaphore, #tpu.memory_space<semaphore_mem>>) src(%88 : memref<1x10xf32, #tpu.memory_space<any>>) dst(%89 : memref<1x10xf32, #tpu.memory_space<vmem>>)
    %c8_i32_66 = arith.constant 8 : i32
    %92 = arith.subi %c8_i32_66, %3 : i32
    %c8_i32_67 = arith.constant 8 : i32
    %93 = arith.minsi %c8_i32_67, %92 : i32
    %94 = tpu.iota {dimensions = array<i32: 0>} : vector<8x10xi32>
    %95 = vector.broadcast %93 : i32 to vector<8x10xi32>
    %96 = arith.cmpi slt, %94, %95 : vector<8x10xi32>
    %c0 = arith.constant 0 : index
    %c0_68 = arith.constant 0 : index
    %97 = vector.load %arg6[%c0, %c0_68] : memref<8x10xf32, #tpu.memory_space<vmem>>, vector<8x10xf32>
    %cst = arith.constant 0.000000e+00 : f32
    %98 = vector.broadcast %cst : f32 to vector<8x10xf32>
    %99 = arith.select %96, %97, %98 : vector<8x10xi1>, vector<8x10xf32>
    %c0_69 = arith.constant 0 : index
    %c0_70 = arith.constant 0 : index
    %100 = vector.load %arg8[%c0_69, %c0_70] : memref<1x10xf32, #tpu.memory_space<vmem>>, vector<1x10xf32>
    %cst_71 = arith.constant dense<0.000000e+00> : vector<10xf32>
    %101 = vector.multi_reduction <add>, %99, %cst_71 [0] : vector<8x10xf32> to vector<10xf32>
    %102 = vector.shape_cast %101 : vector<10xf32> to vector<1x10xf32>
    %103 = arith.addf %100, %102 : vector<1x10xf32>
    %c0_72 = arith.constant 0 : index
    %c0_73 = arith.constant 0 : index
    %104 = vector.load %arg8[%c0_72, %c0_73] : memref<1x10xf32, #tpu.memory_space<vmem>>, vector<1x10xf32>
    tpu.vector_store %arg8[%c0_72, %c0_73], %103 {strides = array<i32>} : memref<1x10xf32, #tpu.memory_space<vmem>>, vector<1x10xf32>,
    %c0_i32_74 = arith.constant 0 : i32
    %105 = arith.cmpi eq, %arg0, %c0_i32_74 : i32
    %106 = arith.extui %105 : i1 to i32
    %c0_i32_75 = arith.constant 0 : i32
    %107 = arith.cmpi ne, %106, %c0_i32_75 : i32
    scf.if %107 {
      %c0_76 = arith.constant 0 : index
      %c0_77 = arith.constant 0 : index
      %108 = vector.load %arg8[%c0_76, %c0_77] : memref<1x10xf32, #tpu.memory_space<vmem>>, vector<1x10xf32>
      %cst_78 = arith.constant 0.000000e+00 : f32
      %109 = vector.broadcast %cst_78 : f32 to vector<1x10xf32>
      %110 = arith.maximumf %108, %109 : vector<1x10xf32>
      %c0_79 = arith.constant 0 : index
      %c0_80 = arith.constant 0 : index
      %111 = vector.load %arg3[%c0_79, %c0_80] : memref<2x10xf32, #tpu.memory_space<vmem>>, vector<2x10xf32>
      %112 = vector.broadcast %110 : vector<1x10xf32> to vector<2x10xf32>
      %113 = arith.mulf %112, %111 : vector<2x10xf32>
      %cst_81 = arith.constant dense<0.000000e+00> : vector<2xf32>
      %114 = vector.multi_reduction <add>, %113, %cst_81 [1] : vector<2x10xf32> to vector<2xf32>
      %115 = vector.shape_cast %114 : vector<2xf32> to vector<2x1xf32>
      %c0_82 = arith.constant 0 : index
      %c0_83 = arith.constant 0 : index
      %116 = vector.load %arg4[%c0_82, %c0_83] : memref<2x1xf32, #tpu.memory_space<vmem>>, vector<2x1xf32>
      %117 = arith.addf %115, %116 : vector<2x1xf32>
      %cst_84 = arith.constant dense<0xFF800000> : vector<1xf32>
      %118 = vector.multi_reduction <maximumf>, %117, %cst_84 [0] : vector<2x1xf32> to vector<1xf32>
      %119 = vector.shape_cast %118 : vector<1xf32> to vector<1x1xf32>
      %120 = vector.broadcast %119 : vector<1x1xf32> to vector<2x1xf32>
      %121 = arith.subf %117, %120 : vector<2x1xf32>
      %122 = math.exp %121 : vector<2x1xf32>
      %cst_85 = arith.constant dense<0.000000e+00> : vector<1xf32>
      %123 = vector.multi_reduction <add>, %122, %cst_85 [0] : vector<2x1xf32> to vector<1xf32>
      %124 = vector.shape_cast %123 : vector<1xf32> to vector<1x1xf32>
      %125 = math.log %124 : vector<1x1xf32>
      %126 = vector.broadcast %125 : vector<1x1xf32> to vector<2x1xf32>
      %127 = arith.subf %121, %126 : vector<2x1xf32>
      %c0_86 = arith.constant 0 : index
      %c0_87 = arith.constant 0 : index
      %128 = vector.load %arg5[%c0_86, %c0_87] : memref<2x1xf32, #tpu.memory_space<vmem>>, vector<2x1xf32>
      tpu.vector_store %arg5[%c0_86, %c0_87], %127 {strides = array<i32>} : memref<2x1xf32, #tpu.memory_space<vmem>>, vector<2x1xf32>,
    } else {
    }
    return
  }
  func.func @transform_1(%arg0: i32, %arg1: memref<8xi32, #tpu.memory_space<smem>>) -> (i32, i32) {
    %c0_i32 = arith.constant 0 : i32
    %c0_i32_0 = arith.constant 0 : i32
    %c0_i32_1 = arith.constant 0 : i32
    return %c0_i32, %c0_i32_0 : i32, i32
  }
  func.func @transform_2(%arg0: i32, %arg1: memref<8xi32, #tpu.memory_space<smem>>) -> (i32, i32) {
    %c0_i32 = arith.constant 0 : i32
    %c0_i32_0 = arith.constant 0 : i32
    %c0_i32_1 = arith.constant 0 : i32
    return %c0_i32, %c0_i32_0 : i32, i32
  }
  func.func @transform_3(%arg0: i32, %arg1: memref<8xi32, #tpu.memory_space<smem>>) -> (i32, i32) {
    %c0_i32 = arith.constant 0 : i32
    %c0_i32_0 = arith.constant 0 : i32
    %c0_i32_1 = arith.constant 0 : i32
    return %c0_i32, %c0_i32_0 : i32, i32
  }
}

</mosaic_0001>

<bundles_post_ra>
// kernel: tpu_custom_call.1
= control target key start
LH: loop header
LB: loop body
LE: loop exit
PB: predicated region body
PF: predicated region fallthrough
CT: control target
= control target key end

     0   :  { %s767_s0 = inlined_call_operand.vmem [shape: s32[8], index: 0, kind: input, shape index: {}]   ;;  %s768_s1 = inlined_call_operand.vmem [shape: f32[32,10], index: 1, kind: input, shape index: {}]   ;;  %s769_s2 = inlined_call_operand.vmem [shape: f32[2,10], index: 2, kind: input, shape index: {}]   ;;  %s770_s3 = inlined_call_operand.vmem [shape: f32[2,1], index: 3, kind: input, shape index: {}]   ;;  %s771_s4 = inlined_call_operand.vmem [shape: f32[2,1], index: 4, kind: output, shape index: {}]  }
   0x1   :  { %s9_s17 = sshll.u32 %s767_s0, 4  ;;  %s10_s17 = int_to_ptr.vmem [resolvable:$true] %s9_s17 }
   0x2   :  { %s669_s18 = scalar_lea.vmem %s10_s17, 16  ;;  %p674_p1 = scmp.lt.s32.totalorder %s10_s17, %s10_s17 }
   0x3   :  { %p670_p0 = scmp.ne.s32.totalorder %s10_s17, %s669_s18  ;;  %p675_p2 = scmp.lt.s32.totalorder %s669_s18, %s669_s18 }
   0x5   :  { %p676_p3 = por %p675_p2, %p674_p1 }
   0x7   :  { %p677_p4 = pnand %p676_p3, %p670_p0 }
   0x9   :  { %680 = shalt.err (!%p677_p4)  }
   0xa   :  { %s699_s19 = smov [#allocation6]  }
   0xb   :  { %12 = dma.vmem_to_smem %s10_s17, 16, %s699_s19, [#allocation5] }
   0xc   :  { %681 = dma.done.wait [#allocation5], 16 }
   0xd   :  { %682 = vsyncadd [#allocation5], 4294967280 }
   0xe   :  { %14 = sfence }
   0xf   :  { %vm23_vm0 = vcmask 73728   ;;  %s26_s20 = sld [smem:[#allocation6]]  ;;  %v700_v0 = vmov 0.0  }
  0x10   :  { %24 = vst.msk [vmem:[#allocation4] sm:$0x1] %vm23_vm0, %v700_v0 }
  0x15   :  { %s27_s22 = scalar_lea.vmem %s768_s1, %s26_s20 }
  0x16   :  { %v45_v1 = vld [vmem:[%s27_s22] sm:$0x1] }
  0x17   :  { %46 = vst [vmem:[#allocation2] sm:$0x1] %v45_v1 }
  0x18   :  { %71 = vsyncadd [#allocation3], 16  ;;  %s648_s23 = sld [smem:[#allocation6 + $0x1]] }
  0x1e   :  { %s74_s26 = scalar_lea.vmem %s768_s1, %s648_s23 }
  0x1f   :  { %v94_v2 = vld [vmem:[%s74_s26] sm:$0x1] }
  0x20   :  { %95 = vst [vmem:[#allocation2 + $0x1] sm:$0x1] %v94_v2 }
  0x21   :  { %120 = vsyncadd [#allocation3 + $0x1], 16  ;;  %s649_s27 = sld [smem:[#allocation6 + $0x2]] }
  0x27   :  { %s123_s30 = scalar_lea.vmem %s768_s1, %s649_s27 }
  0x28   :  { %v143_v3 = vld [vmem:[%s123_s30] sm:$0x1] }
  0x29   :  { %144 = vst [vmem:[#allocation2 + $0x2] sm:$0x1] %v143_v3 }
  0x2a   :  { %169 = vsyncadd [#allocation3 + $0x2], 16  ;;  %s650_s5 = sld [smem:[#allocation6 + $0x3]] }
  0x30   :  { %s172_s8 = scalar_lea.vmem %s768_s1, %s650_s5 }
  0x31   :  { %v192_v4 = vld [vmem:[%s172_s8] sm:$0x1] }
  0x32   :  { %193 = vst [vmem:[#allocation2 + $0x3] sm:$0x1] %v192_v4 }
  0x33   :  { %218 = vsyncadd [#allocation3 + $0x3], 16  ;;  %s651_s9 = sld [smem:[#allocation6 + $0x4]] }
  0x39   :  { %s221_s12 = scalar_lea.vmem %s768_s1, %s651_s9 }
  0x3a   :  { %v241_v5 = vld [vmem:[%s221_s12] sm:$0x1] }
  0x3b   :  { %242 = vst [vmem:[#allocation2 + $0x4] sm:$0x1] %v241_v5 }
  0x3c   :  { %267 = vsyncadd [#allocation3 + $0x4], 16  ;;  %s652_s13 = sld [smem:[#allocation6 + $0x5]] }
  0x42   :  { %s270_s16 = scalar_lea.vmem %s768_s1, %s652_s13 }
  0x43   :  { %v290_v6 = vld [vmem:[%s270_s16] sm:$0x1] }
  0x44   :  { %291 = vst [vmem:[#allocation2 + $0x5] sm:$0x1] %v290_v6 }
  0x45   :  { %316 = vsyncadd [#allocation3 + $0x5], 16  ;;  %s653_s17 = sld [smem:[#allocation6 + $0x6]] }
  0x4b   :  { %s319_s20 = scalar_lea.vmem %s768_s1, %s653_s17 }
  0x4c   :  { %v339_v7 = vld [vmem:[%s319_s20] sm:$0x1] }
  0x4d   :  { %340 = vst [vmem:[#allocation2 + $0x6] sm:$0x1] %v339_v7 }
  0x4e   :  { %365 = vsyncadd [#allocation3 + $0x6], 16  ;;  %s654_s21 = sld [smem:[#allocation6 + $0x7]] }
  0x54   :  { %s368_s23 = scalar_lea.vmem %s768_s1, %s654_s21 }
  0x55   :  { %v388_v8 = vld [vmem:[%s368_s23] sm:$0x1] }
  0x56   :  { %389 = vst [vmem:[#allocation2 + $0x7] sm:$0x1] %v388_v8 }
  0x57   :  { %414 = vsyncadd [#allocation3 + $0x7], 16 }
  0x58   :  { %683 = dma.done.wait [#allocation3], 16 }
  0x59   :  { %684 = vsyncadd [#allocation3], 4294967280 }
  0x5a   :  { %685 = dma.done.wait [#allocation3 + $0x1], 16 }
  0x5b   :  { %686 = vsyncadd [#allocation3 + $0x1], 4294967280 }
  0x5c   :  { %687 = dma.done.wait [#allocation3 + $0x2], 16 }
  0x5d   :  { %688 = vsyncadd [#allocation3 + $0x2], 4294967280 }
  0x5e   :  { %689 = dma.done.wait [#allocation3 + $0x3], 16 }
  0x5f   :  { %690 = vsyncadd [#allocation3 + $0x3], 4294967280 }
  0x60   :  { %691 = dma.done.wait [#allocation3 + $0x4], 16 }
  0x61   :  { %692 = vsyncadd [#allocation3 + $0x4], 4294967280 }
  0x62   :  { %693 = dma.done.wait [#allocation3 + $0x5], 16 }
  0x63   :  { %694 = vsyncadd [#allocation3 + $0x5], 4294967280 }
  0x64   :  { %695 = dma.done.wait [#allocation3 + $0x6], 16 }
  0x65   :  { %696 = vsyncadd [#allocation3 + $0x6], 4294967280 }
  0x66   :  { %697 = dma.done.wait [#allocation3 + $0x7], 16 }
  0x67   :  { %698 = vsyncadd [#allocation3 + $0x7], 4294967280  ;;  %vm442_vm1 = vcmask 80896   ;;  %v439_v9 = vld [vmem:[#allocation2] sm:$0xff]  ;;  %v441_v16 = vld [vmem:[#allocation4] sm:$0x1]  ;;  %v460_v19 = vlaneseq }
  0x68   :  { %v443_v10 = vsel %vm442_vm1, %v439_v9, 0.0  ;;  %v458_v24 = vld [vmem:[%s769_s2] sm:$0x3]  ;;  %vm466_vm2 = vcmask 74752   ;;  %vm472_vm3 = vcmask 1024  }
  0x69   :  { %v444_v11 = vrot.slane %v443_v10, 4  ;;  %v461_v20 = vshrl.u32 %v460_v19, 7  ;;  %v470_v28 = vld [vmem:[%s770_s3] sm:$0x3] }
  0x6b   :  { %v445_v12 = vadd.f32 %v444_v11, %v443_v10  ;;  %v462_v21 = vsub.s32 0, %v461_v20 }
  0x6d   :  { %v446_v13 = vrot.slane %v445_v12, 2 }
  0x6f   :  { %v447_v14 = vadd.f32 %v446_v13, %v445_v12 }
  0x71   :  { %v448_v15 = vrot.slane %v447_v14, 1 }
  0x73   :  { %v449_v17 = vadd.f32 %v448_v15, %v447_v14 }
  0x75   :  { %v450_v18 = vadd.f32 %v449_v17, %v441_v16 }
  0x77   :  { %452 = vst.msk [vmem:[#allocation4] sm:$0x1] %vm23_vm0, %v450_v18 }
  0x7e   :  { %v456_v22 = vld [vmem:[#allocation4] sm:$0x1] }
  0x7f   :  { %v457_v23 = vmax.f32 %v456_v22, 0.0 }
  0x81   :  { %v463_v25 = vrot.slane %v457_v23, %v462_v21 }
  0x83   :  { %v465_v26 = vmul.f32 %v463_v25, %v458_v24 }
  0x85   :  { %v467_v27 = vsel %vm466_vm2, %v465_v26, 0.0 }
  0x86   :  { %468 = vadd.xlane.f32.xlu0 %v467_v27 }
 0x113   :  { %v469_v29 = vpop.xlane.xlu0 %468 }
 0x114   :  { %v471_v30 = vadd.f32 %v470_v28, %v469_v29 }
 0x116   :  { %v473_v31 = vsel %vm472_vm3, %v471_v30, -inf }
 0x117   :  { %v474_v32 = vrot.slane %v473_v31, 4 }
 0x119   :  { %v475_v33 = vmax.f32 %v473_v31, %v474_v32 }
 0x11b   :  { %v476_v34 = vrot.slane %v475_v33, 2 }
 0x11d   :  { %v477_v35 = vmax.f32 %v475_v33, %v476_v34 }
 0x11f   :  { %v478_v36 = vrot.slane %v477_v35, 1 }
 0x121   :  { %v479_v37 = vmax.f32 %v477_v35, %v478_v36 }
 0x123   :  { %v480_v38 = vsub.f32 %v471_v30, %v479_v37 }
 0x125   :  { %v481_v39 = vmul.f32 1.442695, %v480_v38 }
 0x127   :  { %665 = vpow2.f32 %v481_v39 }
 0x131   :  { %v666_v40 = vpop.eup %665 }
 0x132   :  { %v483_v41 = vsel %vm472_vm3, %v666_v40, 0.0 }
 0x133   :  { %v484_v42 = vrot.slane %v483_v41, 4 }
 0x135   :  { %v485_v43 = vadd.f32 %v484_v42, %v483_v41 }
 0x137   :  { %v486_v44 = vrot.slane %v485_v43, 2 }
 0x139   :  { %v487_v45 = vadd.f32 %v486_v44, %v485_v43 }
 0x13b   :  { %v488_v46 = vrot.slane %v487_v45, 1 }
 0x13d   :  { %v489_v47 = vadd.f32 %v488_v46, %v487_v45 }
 0x13f   :  { %667 = vlog2.f32 %v489_v47 }
 0x149   :  { %v668_v48 = vpop.eup %667 }
 0x14a   :  { %v491_v49 = vmul.f32 0.6931472, %v668_v48 }
 0x14c   :  { %v492_v50 = vsub.f32 %v480_v38, %v491_v49 }
 0x14e   :  { %493 = vst.msk [vmem:[%s771_s4] sm:$0x3] %vm472_vm3, %v492_v50 }
 0x14f   :  { %498 = vsyncmov [#allocation3] }
 0x152   :  { %s499_s27 = vpop.sfrf %498 }
 0x153   :  { %p655_p5 = scmp.ne.s32.totalorder %s499_s27, 0 }
 0x155   :  { %503 = shalt.err (%p655_p5)  }
 0x156   :  { %505 = vsyncmov [#allocation3 + $0x1] }
 0x159   :  { %s506_s28 = vpop.sfrf %505 }
 0x15a   :  { %p656_p6 = scmp.ne.s32.totalorder %s506_s28, 0 }
 0x15c   :  { %510 = shalt.err (%p656_p6)  }
 0x15d   :  { %512 = vsyncmov [#allocation3 + $0x2] }
 0x160   :  { %s513_s29 = vpop.sfrf %512 }
 0x161   :  { %p657_p7 = scmp.ne.s32.totalorder %s513_s29, 0 }
 0x163   :  { %517 = shalt.err (%p657_p7)  }
 0x164   :  { %519 = vsyncmov [#allocation3 + $0x3] }
 0x167   :  { %s520_s30 = vpop.sfrf %519 }
 0x168   :  { %p658_p8 = scmp.ne.s32.totalorder %s520_s30, 0 }
 0x16a   :  { %524 = shalt.err (%p658_p8)  }
 0x16b   :  { %526 = vsyncmov [#allocation3 + $0x4] }
 0x16e   :  { %s527_s5 = vpop.sfrf %526 }
 0x16f   :  { %p659_p9 = scmp.ne.s32.totalorder %s527_s5, 0 }
 0x171   :  { %531 = shalt.err (%p659_p9)  }
 0x172   :  { %533 = vsyncmov [#allocation3 + $0x5] }
 0x175   :  { %s534_s4 = vpop.sfrf %533 }
 0x176   :  { %p660_p10 = scmp.ne.s32.totalorder %s534_s4, 0 }
 0x178   :  { %538 = shalt.err (%p660_p10)  }
 0x179   :  { %540 = vsyncmov [#allocation3 + $0x6] }
 0x17c   :  { %s541_s6 = vpop.sfrf %540 }
 0x17d   :  { %p661_p11 = scmp.ne.s32.totalorder %s541_s6, 0 }
 0x17f   :  { %545 = shalt.err (%p661_p11)  }
 0x180   :  { %547 = vsyncmov [#allocation3 + $0x7] }
 0x183   :  { %s548_s7 = vpop.sfrf %547 }
 0x184   :  { %p662_p12 = scmp.ne.s32.totalorder %s548_s7, 0 }
 0x186   :  { %552 = shalt.err (%p662_p12)  }

</bundles_post_ra>
